<compile_context>
chip_gen: v6e
topology: v6e:2x2x1
jax: 0.10.0
libtpu: 0.0.40
codegen_flags: <defaults>
</compile_context>

<pallas_src>
import math

import jax
import jax.numpy as jnp
from jax.experimental import pallas as pl
from jax.experimental.pallas import tpu as pltpu


def _round_up(x, m):
    return ((x + m - 1) // m) * m


def _make_kernel(KH, tn):
    """Fused conv + 2x2 maxpool + ReLU on one (batch-block, N-tile) grid step.

    refs = (slab_0 .. slab_KH, w_ref, out_ref)
      slab_t : (M, Lp)         slab_t[b*Ho+r, :] = padded input row 2r+t of image b
      w_ref  : (KH, Lp, 2*tn)  block-Toeplitz conv+pool weights for this N tile
                               (columns [0,tn) = dx=0 half, [tn,2tn) = dx=1 half)
      out_ref: (M, tn)         pooled + ReLU output columns of this N tile
    """
    n_slabs = KH + 1

    def kernel(*refs):
        slab_refs = refs[:n_slabs]
        w_ref = refs[n_slabs]
        out_ref = refs[n_slabs + 1]

        slabs = [r[...] for r in slab_refs]          # (M, Lp) each, no relayout

        # Vertical pool phase dy=0 uses taps 0..KH-1, dy=1 uses taps 1..KH.
        w0 = w_ref[0]
        p0 = jnp.dot(slabs[0], w0, preferred_element_type=jnp.float32)
        p1 = jnp.dot(slabs[1], w0, preferred_element_type=jnp.float32)
        for kh in range(1, KH):
            wk = w_ref[kh]
            p0 = p0 + jnp.dot(slabs[kh], wk, preferred_element_type=jnp.float32)
            p1 = p1 + jnp.dot(slabs[kh + 1], wk, preferred_element_type=jnp.float32)

        pm = jnp.maximum(p0, p1)                       # max over dy          (M, 2*tn)
        pooled = jnp.maximum(pm[:, :tn], pm[:, tn:])   # max over dx (lane-aligned)
        out_ref[...] = jnp.maximum(pooled, 0.0).astype(out_ref.dtype)   # ReLU

    return kernel


def _build_pool_conv_weight(weight_oihw, Wp, Wo, Lp, Npad, tn, dtype):
    """Banded block-Toeplitz weights folding conv kw-taps and the horizontal
    pooling phase dx into the matmul N dimension, tiled over N.

    Returns (KH, Lp, ntiles*2*tn) with column index  j*(2*tn) + dx*tn + n  for
    global output column Q = j*tn + n (Q = c*Cout + co):
        W[kh, wp*Cin+ci, ...] = w[co, ci, kh, wp - (2c+dx)]
    (zero outside 0 <= wp-(2c+dx) < KW, zero in the L / N padding regions).
    """
    Cout, Cin, KH, KW = weight_oihw.shape
    L, N = Wp * Cin, Wo * Cout
    wthw = jnp.transpose(weight_oihw, (2, 3, 1, 0))          # (KH, KW, Cin, Cout)
    wp = jnp.arange(Wp)[:, None]                             # (Wp, 1)
    c = jnp.arange(Wo)[None, :]                              # (1, Wo)
    halves = []
    for dx in (0, 1):
        kwi = wp - (2 * c + dx)                              # (Wp, Wo)
        valid = (kwi >= 0) & (kwi < KW)
        kwc = jnp.clip(kwi, 0, KW - 1)
        g = wthw[:, kwc, :, :]                               # (KH, Wp, Wo, Cin, Cout)
        g = jnp.where(valid[None, :, :, None, None], g, 0.0)
        g = jnp.transpose(g, (0, 1, 3, 2, 4))                # (KH, Wp, Cin, Wo, Cout)
        halves.append(g.reshape(KH, L, N))
    w = jnp.stack(halves, axis=2)                            # (KH, L, 2, N)
    w = jnp.pad(w, ((0, 0), (0, Lp - L), (0, 0), (0, Npad - N)))
    ntiles = Npad // tn
    w = w.reshape(KH, Lp, 2, ntiles, tn)
    w = jnp.transpose(w, (0, 1, 3, 2, 4))                    # (KH, Lp, ntiles, 2, tn)
    return w.reshape(KH, Lp, ntiles * 2 * tn).astype(dtype)


def conv_pool_ac(x_nchw, weight_oihw, *, padding=1, block_b=None, tn_max=512,
                 compute_dtype=jnp.bfloat16, out_dtype=None):
    """Forward of ConvPoolAc: Conv2d(k,s=1,p,bias=False) -> MaxPool2d(2,2,floor) -> ReLU.

    x_nchw:      (B, Cin, H, W)      NCHW
    weight_oihw: (Cout, Cin, KH, KW) PyTorch OIHW
    returns:     (B, Cout, Ho, Wo)   NCHW (dtype = out_dtype or x dtype)

    compute_dtype=jnp.float32 gives an f32-exact path (default bf16 + f32 acc).
    """
    B, Cin, H, W = x_nchw.shape
    Cout, Cin_w, KH, KW = weight_oihw.shape
    assert Cin == Cin_w, "channel mismatch"
    out_dtype = x_nchw.dtype if out_dtype is None else out_dtype

    Hc = H + 2 * padding - KH + 1              # conv output size (stride 1)
    Wc = W + 2 * padding - KW + 1
    Ho, Wo = Hc // 2, Wc // 2                  # floor-mode 2x2 pooling
    assert Ho >= 1 and Wo >= 1, "input too small for 2x2 pooling"
    Hp, Wp = H + 2 * padding, W + 2 * padding
    L, N = Wp * Cin, Wo * Cout
    Lp = _round_up(L, 128)                     # lane-padded contraction length
    Npad = _round_up(N, 128)                   # lane-padded output width

    # ---- N tile (multiple of 128, divides Npad) -> bounds weight VMEM ----
    tn = 128
    for cand in range(min(tn_max, Npad), 127, -128):
        if Npad % cand == 0:
            tn = cand
            break
    ntiles = Npad // tn

    # ---- batch block: M = bt*Ho multiple of 8, ~>=256 when batch allows ----
    # (no grid>=2 cap: megacore shards the parallel N axis instead of shrinking M)
    step = 8 // math.gcd(Ho, 8)
    bt_cap = step * pl.cdiv(B, step)
    bt_want = step * pl.cdiv(256, Ho * step)
    bt = max(step, min(bt_want, bt_cap))
    if block_b is not None:
        bt = max(step, min(bt, step * pl.cdiv(block_b, step)))
    Bp = bt * pl.cdiv(B, bt)
    M = Bp * Ho

    # ---- wrapper glue (fuses under jit): NCHW -> zero-padded NHWC rows ----
    # TODO(synk): keeping activations NHWC end-to-end would remove this transpose.
    xh = jnp.transpose(x_nchw, (0, 2, 3, 1))                             # (B,H,W,Cin)
    xp = jnp.pad(xh, ((0, 0), (padding, padding), (padding, padding), (0, 0)))
    xr = xp.reshape(B, Hp, L)
    xr = jnp.pad(xr, ((0, Bp - B), (0, 0), (0, Lp - L))).astype(compute_dtype)

    # KH+1 row-shifted slabs, each fully contiguous (M, Lp):
    #   slab_t[b*Ho + r, :] == padded input row (2r + t) of image b.
    # (~2x input HBM re-read; removes all in-kernel slab copies / reshapes.)
    slabs = [xr[:, t:t + 2 * Ho:2, :].reshape(M, Lp) for t in range(KH + 1)]

    # conv+pool block-Toeplitz weights, tiled over N
    wbig = _build_pool_conv_weight(weight_oihw, Wp, Wo, Lp, Npad, tn, compute_dtype)

    # ---- specs / grid ----
    slab_spec = pl.BlockSpec((bt * Ho, Lp), lambda i, j: (i, 0))
    w_kwargs = {"pipeline_mode": pl.Buffered(1)} if ntiles == 1 else {}
    w_spec = pl.BlockSpec((KH, Lp, 2 * tn), lambda i, j: (0, 0, j), **w_kwargs)
    out_spec = pl.BlockSpec((bt * Ho, tn), lambda i, j: (i, j))
    grid = (Bp // bt, ntiles)                  # N axis innermost -> input block stays resident

    itemsize = jnp.dtype(compute_dtype).itemsize
    out_itemsize = jnp.dtype(out_dtype).itemsize
    slab_block = bt * Ho * Lp * itemsize
    w_block = KH * Lp * 2 * tn * itemsize
    out_block = bt * Ho * tn * out_itemsize
    acc_bytes = 2 * bt * Ho * 2 * tn * 4
    w_bufs = 1 if ntiles == 1 else 2
    vmem_need = ((KH + 1) * slab_block * 2 + w_block * w_bufs
                 + out_block * 2 + acc_bytes)
    vmem_limit = int(min(64 * 1024 * 1024,
                         max(32 * 1024 * 1024, (vmem_need * 3) // 2 + (2 << 20))))

    flops = 8 * KH * M * Lp * Npad             # 2*KH matmuls of (M,Lp)x(Lp,2*Npad)
    bytes_accessed = ((KH + 1) * M * Lp * itemsize
                      + KH * Lp * 2 * Npad * itemsize
                      + M * Npad * out_itemsize)

    out = pl.pallas_call(
        _make_kernel(KH, tn),
        out_shape=jax.ShapeDtypeStruct((M, Npad), out_dtype),
        grid=grid,
        in_specs=[slab_spec] * (KH + 1) + [w_spec],
        out_specs=out_spec,
        compiler_params=pltpu.CompilerParams(
            dimension_semantics=("parallel", "parallel"),
            vmem_limit_bytes=vmem_limit,
        ),
        cost_estimate=pl.CostEstimate(
            flops=int(flops), transcendentals=0, bytes_accessed=int(bytes_accessed)),
    )(*slabs, wbig)

    out = out[:B * Ho, :N].reshape(B, Ho, Wo, Cout)
    return jnp.transpose(out, (0, 3, 1, 2))        # back to NCHW


def _reference(x_nchw, weight_oihw, padding=1):
    """Plain-JAX f32 reference matching the PyTorch module semantics."""
    conv = jax.lax.conv_general_dilated(
        x_nchw, weight_oihw, window_strides=(1, 1),
        padding=((padding, padding), (padding, padding)),
        dimension_numbers=("NCHW", "OIHW", "NCHW"),
    )
    pooled = jax.lax.reduce_window(
        conv, -jnp.inf, jax.lax.max,
        window_dimensions=(1, 1, 2, 2), window_strides=(1, 1, 2, 2),
        padding="VALID",  # ceil_mode=False
    )
    return jnp.maximum(pooled, 0.0)


if __name__ == "__main__":
    key = jax.random.PRNGKey(0)
    kx, kw, kx2, kw2 = jax.random.split(key, 4)
    fwd = jax.jit(conv_pool_ac)

    # Case 1: shapes consistent with the module (chanIn=4 -> chanOut=8), 16x16.
    B, Cin, H, W, Cout = 2, 4, 16, 16, 8
    x = jax.random.normal(kx, (B, Cin, H, W), dtype=jnp.float32)
    weight = jax.random.normal(kw, (Cout, Cin, 3, 3), dtype=jnp.float32) * 0.1
    out = jax.block_until_ready(fwd(x, weight))
    ref = _reference(x, weight)
    assert out.shape == (B, Cout, H // 2, W // 2), out.shape
    # bf16 inputs with f32 accumulation -> loosened tolerance vs the f32 reference
    assert jnp.allclose(out, ref, atol=2e-2, rtol=2e-2), (
        "case1 mismatch, max abs diff = %f" % float(jnp.max(jnp.abs(out - ref))))

    # Case 2: odd spatial size (locks in floor-mode pool edge) + ragged L/N padding.
    B2, C2i, H2, W2, C2o = 2, 3, 15, 15, 5
    x2 = jax.random.normal(kx2, (B2, C2i, H2, W2), dtype=jnp.float32)
    w2 = jax.random.normal(kw2, (C2o, C2i, 3, 3), dtype=jnp.float32) * 0.1
    out2 = jax.block_until_ready(fwd(x2, w2))
    ref2 = _reference(x2, w2)
    assert out2.shape == ref2.shape, (out2.shape, ref2.shape)
    assert jnp.allclose(out2, ref2, atol=2e-2, rtol=2e-2), (
        "case2 mismatch, max abs diff = %f" % float(jnp.max(jnp.abs(out2 - ref2))))

    print("KERNEL_OK")
</pallas_src>

<mosaic_0001>
module attributes {stable_mosaic.version = 11 : i64} {
  func.func @kernel(%arg0: i32, %arg1: i32, %arg2: memref<16x128xbf16, #tpu.memory_space<vmem>>, %arg3: memref<16x128xbf16, #tpu.memory_space<vmem>>, %arg4: memref<16x128xbf16, #tpu.memory_space<vmem>>, %arg5: memref<16x128xbf16, #tpu.memory_space<vmem>>, %arg6: memref<3x128x256xbf16, #tpu.memory_space<vmem>>, %arg7: memref<16x128xf32, #tpu.memory_space<vmem>>) attributes {dimension_semantics = [#tpu.dimension_semantics<parallel>, #tpu.dimension_semantics<parallel>], iteration_bounds = array<i64: 1, 1>, scalar_prefetch = 0 : i64, scratch_operands = 0 : i64, tpu.core_type = #tpu.core_type<tc>, window_params = [{transform_indices = @transform_0, window_bounds = array<i64: 16, 128>}, {transform_indices = @transform_1, window_bounds = array<i64: 16, 128>}, {transform_indices = @transform_2, window_bounds = array<i64: 16, 128>}, {transform_indices = @transform_3, window_bounds = array<i64: 16, 128>}, {pipeline_mode = #tpu.pipeline_mode<synchronous>, transform_indices = @transform_4, window_bounds = array<i64: 3, 128, 256>}, {transform_indices = @transform_5, window_bounds = array<i64: 16, 128>}]} {
    %c0 = arith.constant 0 : index
    %c0_0 = arith.constant 0 : index
    %0 = vector.load %arg2[%c0, %c0_0] : memref<16x128xbf16, #tpu.memory_space<vmem>>, vector<16x128xbf16>
    %c0_1 = arith.constant 0 : index
    %c0_2 = arith.constant 0 : index
    %1 = vector.load %arg3[%c0_1, %c0_2] : memref<16x128xbf16, #tpu.memory_space<vmem>>, vector<16x128xbf16>
    %c0_3 = arith.constant 0 : index
    %c0_4 = arith.constant 0 : index
    %2 = vector.load %arg4[%c0_3, %c0_4] : memref<16x128xbf16, #tpu.memory_space<vmem>>, vector<16x128xbf16>
    %c0_5 = arith.constant 0 : index
    %c0_6 = arith.constant 0 : index
    %3 = vector.load %arg5[%c0_5, %c0_6] : memref<16x128xbf16, #tpu.memory_space<vmem>>, vector<16x128xbf16>
    %c0_7 = arith.constant 0 : index
    %c0_8 = arith.constant 0 : index
    %c0_9 = arith.constant 0 : index
    %4 = vector.load %arg6[%c0_7, %c0_8, %c0_9] : memref<3x128x256xbf16, #tpu.memory_space<vmem>>, vector<1x128x256xbf16>
    %5 = vector.shape_cast %4 : vector<1x128x256xbf16> to vector<128x256xbf16>
    %cst = arith.constant dense<0.000000e+00> : vector<16x256xf32>
    %6 = tpu.matmul %0, %5, %cst {dimension_numbers = #tpu.dot_dimension_numbers<[1], [0], [0], [1], [0, 0, 1, 1], [], []>} : vector<16x128xbf16>, vector<128x256xbf16>, vector<16x256xf32> -> vector<16x256xf32>
    %cst_10 = arith.constant dense<0.000000e+00> : vector<16x256xf32>
    %7 = tpu.matmul %1, %5, %cst_10 {dimension_numbers = #tpu.dot_dimension_numbers<[1], [0], [0], [1], [0, 0, 1, 1], [], []>} : vector<16x128xbf16>, vector<128x256xbf16>, vector<16x256xf32> -> vector<16x256xf32>
    %c1 = arith.constant 1 : index
    %c0_11 = arith.constant 0 : index
    %c0_12 = arith.constant 0 : index
    %8 = vector.load %arg6[%c1, %c0_11, %c0_12] : memref<3x128x256xbf16, #tpu.memory_space<vmem>>, vector<1x128x256xbf16>
    %9 = vector.shape_cast %8 : vector<1x128x256xbf16> to vector<128x256xbf16>
    %cst_13 = arith.constant dense<0.000000e+00> : vector<16x256xf32>
    %10 = tpu.matmul %1, %9, %cst_13 {dimension_numbers = #tpu.dot_dimension_numbers<[1], [0], [0], [1], [0, 0, 1, 1], [], []>} : vector<16x128xbf16>, vector<128x256xbf16>, vector<16x256xf32> -> vector<16x256xf32>
    %11 = arith.addf %6, %10 : vector<16x256xf32>
    %cst_14 = arith.constant dense<0.000000e+00> : vector<16x256xf32>
    %12 = tpu.matmul %2, %9, %cst_14 {dimension_numbers = #tpu.dot_dimension_numbers<[1], [0], [0], [1], [0, 0, 1, 1], [], []>} : vector<16x128xbf16>, vector<128x256xbf16>, vector<16x256xf32> -> vector<16x256xf32>
    %13 = arith.addf %7, %12 : vector<16x256xf32>
    %c2 = arith.constant 2 : index
    %c0_15 = arith.constant 0 : index
    %c0_16 = arith.constant 0 : index
    %14 = vector.load %arg6[%c2, %c0_15, %c0_16] : memref<3x128x256xbf16, #tpu.memory_space<vmem>>, vector<1x128x256xbf16>
    %15 = vector.shape_cast %14 : vector<1x128x256xbf16> to vector<128x256xbf16>
    %cst_17 = arith.constant dense<0.000000e+00> : vector<16x256xf32>
    %16 = tpu.matmul %2, %15, %cst_17 {dimension_numbers = #tpu.dot_dimension_numbers<[1], [0], [0], [1], [0, 0, 1, 1], [], []>} : vector<16x128xbf16>, vector<128x256xbf16>, vector<16x256xf32> -> vector<16x256xf32>
    %17 = arith.addf %11, %16 : vector<16x256xf32>
    %cst_18 = arith.constant dense<0.000000e+00> : vector<16x256xf32>
    %18 = tpu.matmul %3, %15, %cst_18 {dimension_numbers = #tpu.dot_dimension_numbers<[1], [0], [0], [1], [0, 0, 1, 1], [], []>} : vector<16x128xbf16>, vector<128x256xbf16>, vector<16x256xf32> -> vector<16x256xf32>
    %19 = arith.addf %13, %18 : vector<16x256xf32>
    %20 = arith.maximumf %17, %19 : vector<16x256xf32>
    %21 = vector.extract_strided_slice %20 {offsets = [0, 0], sizes = [16, 128], strides = [1, 1]} : vector<16x256xf32> to vector<16x128xf32>
    %22 = vector.extract_strided_slice %20 {offsets = [0, 128], sizes = [16, 128], strides = [1, 1]} : vector<16x256xf32> to vector<16x128xf32>
    %23 = arith.maximumf %21, %22 : vector<16x128xf32>
    %cst_19 = arith.constant 0.000000e+00 : f32
    %24 = vector.broadcast %cst_19 : f32 to vector<16x128xf32>
    %25 = arith.maximumf %23, %24 : vector<16x128xf32>
    %c0_20 = arith.constant 0 : index
    %c0_21 = arith.constant 0 : index
    %26 = vector.load %arg7[%c0_20, %c0_21] : memref<16x128xf32, #tpu.memory_space<vmem>>, vector<16x128xf32>
    tpu.vector_store %arg7[%c0_20, %c0_21], %25 {strides = array<i32>} : memref<16x128xf32, #tpu.memory_space<vmem>>, vector<16x128xf32>,
    return
  }
  func.func @transform_0(%arg0: i32, %arg1: i32) -> (i32, i32) {
    %c0_i32 = arith.constant 0 : i32
    %c0_i32_0 = arith.constant 0 : i32
    return %arg0, %c0_i32 : i32, i32
  }
  func.func @transform_1(%arg0: i32, %arg1: i32) -> (i32, i32) {
    %c0_i32 = arith.constant 0 : i32
    %c0_i32_0 = arith.constant 0 : i32
    return %arg0, %c0_i32 : i32, i32
  }
  func.func @transform_2(%arg0: i32, %arg1: i32) -> (i32, i32) {
    %c0_i32 = arith.constant 0 : i32
    %c0_i32_0 = arith.constant 0 : i32
    return %arg0, %c0_i32 : i32, i32
  }
  func.func @transform_3(%arg0: i32, %arg1: i32) -> (i32, i32) {
    %c0_i32 = arith.constant 0 : i32
    %c0_i32_0 = arith.constant 0 : i32
    return %arg0, %c0_i32 : i32, i32
  }
  func.func @transform_4(%arg0: i32, %arg1: i32) -> (i32, i32, i32) {
    %c0_i32 = arith.constant 0 : i32
    %c0_i32_0 = arith.constant 0 : i32
    %c0_i32_1 = arith.constant 0 : i32
    return %c0_i32, %c0_i32_0, %arg1 : i32, i32, i32
  }
  func.func @transform_5(%arg0: i32, %arg1: i32) -> (i32, i32) {
    %c0_i32 = arith.constant 0 : i32
    return %arg0, %arg1 : i32, i32
  }
}

</mosaic_0001>

<bundles_post_ra>
// kernel: conv_pool_ac.1
= control target key start
LH: loop header
LB: loop body
LE: loop exit
PB: predicated region body
PF: predicated region fallthrough
CT: control target
= control target key end

     0   :  { %v784_v1 = vmov 0   ;;  %s1043_s4 = inlined_call_operand.vmem [shape: bf16[3,128,256], index: 4, kind: input, shape index: {}]   ;;  %s1044_s1 = inlined_call_operand.vmem [shape: bf16[16,128], index: 1, kind: input, shape index: {}]   ;;  %s1045_s0 = inlined_call_operand.vmem [shape: bf16[16,128], index: 0, kind: input, shape index: {}]   ;;  %s1046_s2 = inlined_call_operand.vmem [shape: bf16[16,128], index: 2, kind: input, shape index: {}]   ;;  %s1047_s3 = inlined_call_operand.vmem [shape: bf16[16,128], index: 3, kind: input, shape index: {}]   ;;  %s1048_s5 = inlined_call_operand.vmem [shape: f32[16,128], index: 5, kind: output, shape index: {}]  }
   0x1   :  { %v818_v0 = vld [vmem:[%s1043_s4 + $0xf4] ss:$8 sps:$4 sm:$0xff]   ;;  %180 = vmatprep.mubr.bf16.mxu0 %v784_v1  ;;  %309 = vmatprep.mubr.bf16.mxu1 %v784_v1  ;;  %v831_v3 = vld [vmem:[%s1043_s4 + $0xf0] ss:$8 sps:$4 sm:$0xff]   ;;  %v842_v5 = vld [vmem:[%s1043_s4 + $0xe4] ss:$8 sps:$4 sm:$0xff]  }
   0x2   :  { %v825_v2 = vld [vmem:[%s1043_s4 + $0x74] ss:$8 sps:$4 sm:$0xff]   ;;  %148 = vmatprep.subr.bf16.mxu0 %v818_v0  ;;  %v836_v4 = vld [vmem:[%s1043_s4 + $0x70] ss:$8 sps:$4 sm:$0xff]   ;;  %v849_v6 = vld [vmem:[%s1043_s4 + $0x64] ss:$8 sps:$4 sm:$0xff]  }
   0x3   :  { %277 = vmatprep.subr.bf16.mxu1 %v825_v2  ;;  %149 = vmatpush1.bf16.msra.mxu0 %v831_v3  ;;  %v854_v7 = vld [vmem:[%s1043_s4 + $0xe0] ss:$8 sps:$4 sm:$0xff]   ;;  %v866_v9 = vld [vmem:[%s1043_s4 + $0xd4] ss:$8 sps:$4 sm:$0xff]   ;;  %v876_v11 = vld [vmem:[%s1043_s4 + $0xd0] ss:$8 sps:$4 sm:$0xff]  }
   0x4   :  { %278 = vmatpush1.bf16.msra.mxu1 %v836_v4  ;;  %150 = vmatprep.subr.bf16.mxu0 %v842_v5  ;;  %v860_v8 = vld [vmem:[%s1043_s4 + $0x60] ss:$8 sps:$4 sm:$0xff]   ;;  %v871_v10 = vld [vmem:[%s1043_s4 + $0x54] ss:$8 sps:$4 sm:$0xff]   ;;  %v881_v12 = vld [vmem:[%s1043_s4 + $0x50] ss:$8 sps:$4 sm:$0xff]  }
   0x5   :  { %279 = vmatprep.subr.bf16.mxu1 %v849_v6  ;;  %v888_v13 = vld [vmem:[%s1043_s4 + $0xc4] ss:$8 sps:$4 sm:$0xff]   ;;  %v900_v15 = vld [vmem:[%s1043_s4 + $0xc0] ss:$8 sps:$4 sm:$0xff]   ;;  %v732_v17 = vld [vmem:[%s1043_s4 + $0xb4] ss:$8 sps:$4 sm:$0xff]  }
   0x6   :  { %v895_v14 = vld [vmem:[%s1043_s4 + $0x44] ss:$8 sps:$4 sm:$0xff]   ;;  %v731_v16 = vld [vmem:[%s1043_s4 + $0x40] ss:$8 sps:$4 sm:$0xff]   ;;  %v734_v18 = vld [vmem:[%s1043_s4 + $0x34] ss:$8 sps:$4 sm:$0xff]  }
   0x7   :  { %151 = vmatpush1.bf16.msra.mxu0 %v854_v7  ;;  %v736_v19 = vld [vmem:[%s1043_s4 + $0xb0] ss:$8 sps:$4 sm:$0xff]   ;;  %v738_v21 = vld [vmem:[%s1043_s4 + $0xa4] ss:$8 sps:$4 sm:$0xff]   ;;  %v742_v23 = vld [vmem:[%s1043_s4 + $0xa0] ss:$8 sps:$4 sm:$0xff]  }
   0x8   :  { %280 = vmatpush1.bf16.msra.mxu1 %v860_v8  ;;  %152 = vmatprep.subr.bf16.mxu0 %v866_v9  ;;  %v737_v20 = vld [vmem:[%s1043_s4 + $0x30] ss:$8 sps:$4 sm:$0xff]   ;;  %v740_v22 = vld [vmem:[%s1043_s4 + $0x24] ss:$8 sps:$4 sm:$0xff]   ;;  %v743_v24 = vld [vmem:[%s1043_s4 + $0x20] ss:$8 sps:$4 sm:$0xff]  }
   0x9   :  { %281 = vmatprep.subr.bf16.mxu1 %v871_v10  ;;  %v744_v25 = vld [vmem:[%s1043_s4 + $0x94] ss:$8 sps:$4 sm:$0xff]   ;;  %v748_v27 = vld [vmem:[%s1043_s4 + $0x90] ss:$8 sps:$4 sm:$0xff]   ;;  %v750_v29 = vld [vmem:[%s1043_s4 + $0x84] ss:$8 sps:$4 sm:$0xff]  }
   0xa   :  { %v746_v26 = vld [vmem:[%s1043_s4 + $0x14] ss:$8 sps:$4 sm:$0xff]   ;;  %v749_v28 = vld [vmem:[%s1043_s4 + $0x10] ss:$8 sps:$4 sm:$0xff]   ;;  %v752_v30 = vld [vmem:[%s1043_s4 + $0x4] ss:$8 sps:$4 sm:$0xff]  }
   0xb   :  { %153 = vmatpush1.bf16.msra.mxu0 %v876_v11  ;;  %v754_v31 = vld [vmem:[%s1043_s4 + $0x80] ss:$8 sps:$4 sm:$0xff]   ;;  %v761_v35 = vld [vmem:[%s1043_s4 + $0x174] ss:$8 sps:$4 sm:$0xff]   ;;  %v759_v37 = vld [vmem:[%s1043_s4 + $0x170] ss:$8 sps:$4 sm:$0xff]  }
   0xc   :  { %282 = vmatpush1.bf16.msra.mxu1 %v881_v12  ;;  %154 = vmatprep.subr.bf16.mxu0 %v888_v13  ;;  %v755_v32 = vld [vmem:[%s1043_s4] ss:$8 sps:$4 sm:$0xff]   ;;  %v764_v38 = vld [vmem:[%s1043_s4 + $0x164] ss:$8 sps:$4 sm:$0xff]   ;;  %v767_v40 = vld [vmem:[%s1043_s4 + $0x154] ss:$8 sps:$4 sm:$0xff]  }
   0xd   :  { %283 = vmatprep.subr.bf16.mxu1 %v895_v14  ;;  %v756_v33 = vld [vmem:[%s1044_s1] sm:$0xff]   ;;  %v765_v41 = vld [vmem:[%s1043_s4 + $0x150] ss:$8 sps:$4 sm:$0xff]   ;;  %v773_v44 = vld [vmem:[%s1043_s4 + $0x134] ss:$8 sps:$4 sm:$0xff]  }
   0xe   :  { %v757_v34 = vld [vmem:[%s1045_s0] sm:$0xff]   ;;  %v771_v45 = vld [vmem:[%s1043_s4 + $0x130] ss:$8 sps:$4 sm:$0xff]   ;;  %v779_v48 = vld [vmem:[%s1043_s4 + $0x114] ss:$8 sps:$4 sm:$0xff]  }
   0xf   :  { %155 = vmatpush1.bf16.msra.mxu0 %v900_v15  ;;  %v758_v36 = vld [vmem:[%s1046_s2] sm:$0xff]   ;;  %v777_v49 = vld [vmem:[%s1043_s4 + $0x110] ss:$8 sps:$4 sm:$0xff]  }
  0x10   :  { %284 = vmatpush1.bf16.msra.mxu1 %v731_v16  ;;  %156 = vmatprep.subr.bf16.mxu0 %v732_v17  ;;  %v762_v39 = vld [vmem:[%s1043_s4 + $0x160] ss:$8 sps:$4 sm:$0xff]   ;;  %v770_v42 = vld [vmem:[%s1043_s4 + $0x144] ss:$8 sps:$4 sm:$0xff]  }
  0x11   :  { %285 = vmatprep.subr.bf16.mxu1 %v734_v18  ;;  %v768_v43 = vld [vmem:[%s1043_s4 + $0x140] ss:$8 sps:$4 sm:$0xff]   ;;  %v776_v46 = vld [vmem:[%s1043_s4 + $0x124] ss:$8 sps:$4 sm:$0xff]  }
  0x12   :  { %v774_v47 = vld [vmem:[%s1043_s4 + $0x120] ss:$8 sps:$4 sm:$0xff]   ;;  %v782_v50 = vld [vmem:[%s1043_s4 + $0x104] ss:$8 sps:$4 sm:$0xff]  }
  0x13   :  { %157 = vmatpush1.bf16.msra.mxu0 %v736_v19  ;;  %v780_v51 = vld [vmem:[%s1043_s4 + $0x100] ss:$8 sps:$4 sm:$0xff]  }
  0x14   :  { %286 = vmatpush1.bf16.msra.mxu1 %v737_v20  ;;  %158 = vmatprep.subr.bf16.mxu0 %v738_v21  ;;  %v783_v52 = vld [vmem:[%s1047_s3] sm:$0xff]  }
  0x15   :  { %287 = vmatprep.subr.bf16.mxu1 %v740_v22 }
  0x17   :  { %159 = vmatpush1.bf16.msra.mxu0 %v742_v23 }
  0x18   :  { %288 = vmatpush1.bf16.msra.mxu1 %v743_v24  ;;  %160 = vmatprep.subr.bf16.mxu0 %v744_v25 }
  0x19   :  { %289 = vmatprep.subr.bf16.mxu1 %v746_v26 }
  0x1b   :  { %161 = vmatpush1.bf16.msra.mxu0 %v748_v27 }
  0x1c   :  { %290 = vmatpush1.bf16.msra.mxu1 %v749_v28  ;;  %162 = vmatprep.subr.bf16.mxu0 %v750_v29 }
  0x1d   :  { %291 = vmatprep.subr.bf16.mxu1 %v752_v30 }
  0x1f   :  { %163 = vmatpush1.bf16.msra.mxu0 %v754_v31 }
  0x20   :  { %292 = vmatpush1.bf16.msra.mxu1 %v755_v32  ;;  %326 = vmatprep.subr.bf16.mxu0 %v818_v0 }
  0x21   :  { %369 = vmatprep.subr.bf16.mxu1 %v825_v2 }
  0x22   :  { %181 = vmatmul.mubr.bf16.vlgmr.msra.gmra.mxu0 %v756_v33 }
  0x23   :  { %310 = vmatmul.mubr.bf16.vlgmr.msra.gmra.mxu1 %v757_v34  ;;  %327 = vmatpush1.bf16.msra.mxu0 %v831_v3 }
  0x24   :  { %370 = vmatpush1.bf16.msra.mxu1 %v836_v4  ;;  %328 = vmatprep.subr.bf16.mxu0 %v842_v5 }
  0x25   :  { %371 = vmatprep.subr.bf16.mxu1 %v849_v6  ;;  %358 = vmatprep.mubr.bf16.mxu0 %v784_v1 }
  0x26   :  { %401 = vmatprep.mubr.bf16.mxu1 %v784_v1 }
  0x27   :  { %329 = vmatpush1.bf16.msra.mxu0 %v854_v7 }
  0x28   :  { %372 = vmatpush1.bf16.msra.mxu1 %v860_v8  ;;  %330 = vmatprep.subr.bf16.mxu0 %v866_v9 }
  0x29   :  { %373 = vmatprep.subr.bf16.mxu1 %v871_v10 }
  0x2b   :  { %331 = vmatpush1.bf16.msra.mxu0 %v876_v11 }
  0x2c   :  { %374 = vmatpush1.bf16.msra.mxu1 %v881_v12  ;;  %332 = vmatprep.subr.bf16.mxu0 %v888_v13 }
  0x2d   :  { %375 = vmatprep.subr.bf16.mxu1 %v895_v14 }
  0x2f   :  { %333 = vmatpush1.bf16.msra.mxu0 %v900_v15 }
  0x30   :  { %376 = vmatpush1.bf16.msra.mxu1 %v731_v16  ;;  %334 = vmatprep.subr.bf16.mxu0 %v732_v17 }
  0x31   :  { %377 = vmatprep.subr.bf16.mxu1 %v734_v18 }
  0x33   :  { %335 = vmatpush1.bf16.msra.mxu0 %v736_v19 }
  0x34   :  { %378 = vmatpush1.bf16.msra.mxu1 %v737_v20  ;;  %336 = vmatprep.subr.bf16.mxu0 %v738_v21 }
  0x35   :  { %379 = vmatprep.subr.bf16.mxu1 %v740_v22 }
  0x37   :  { %337 = vmatpush1.bf16.msra.mxu0 %v742_v23 }
  0x38   :  { %380 = vmatpush1.bf16.msra.mxu1 %v743_v24  ;;  %338 = vmatprep.subr.bf16.mxu0 %v744_v25 }
  0x39   :  { %381 = vmatprep.subr.bf16.mxu1 %v746_v26 }
  0x3b   :  { %339 = vmatpush1.bf16.msra.mxu0 %v748_v27 }
  0x3c   :  { %382 = vmatpush1.bf16.msra.mxu1 %v749_v28  ;;  %340 = vmatprep.subr.bf16.mxu0 %v750_v29 }
  0x3d   :  { %383 = vmatprep.subr.bf16.mxu1 %v752_v30 }
  0x3f   :  { %341 = vmatpush1.bf16.msra.mxu0 %v754_v31 }
  0x40   :  { %384 = vmatpush1.bf16.msra.mxu1 %v755_v32  ;;  %509 = vmatprep.subr.bf16.mxu0 %v761_v35 }
  0x41   :  { %562 = vmatprep.subr.bf16.mxu1 %v761_v35 }
  0x42   :  { %359 = vmatmul.mubr.bf16.vlgmr.msra.gmra.mxu0 %v758_v36 }
  0x43   :  { %402 = vmatmul.mubr.bf16.vlgmr.msra.gmra.mxu1 %v756_v33  ;;  %510 = vmatpush1.bf16.msra.mxu0 %v759_v37 }
  0x44   :  { %563 = vmatpush1.bf16.msra.mxu1 %v759_v37  ;;  %511 = vmatprep.subr.bf16.mxu0 %v764_v38 }
  0x45   :  { %564 = vmatprep.subr.bf16.mxu1 %v764_v38  ;;  %541 = vmatprep.mubr.bf16.mxu0 %v784_v1 }
  0x46   :  { %594 = vmatprep.mubr.bf16.mxu1 %v784_v1 }
  0x47   :  { %512 = vmatpush1.bf16.msra.mxu0 %v762_v39 }
  0x48   :  { %565 = vmatpush1.bf16.msra.mxu1 %v762_v39  ;;  %513 = vmatprep.subr.bf16.mxu0 %v767_v40 }
  0x49   :  { %566 = vmatprep.subr.bf16.mxu1 %v767_v40 }
  0x4b   :  { %514 = vmatpush1.bf16.msra.mxu0 %v765_v41 }
  0x4c   :  { %567 = vmatpush1.bf16.msra.mxu1 %v765_v41  ;;  %515 = vmatprep.subr.bf16.mxu0 %v770_v42 }
  0x4d   :  { %568 = vmatprep.subr.bf16.mxu1 %v770_v42 }
  0x4f   :  { %516 = vmatpush1.bf16.msra.mxu0 %v768_v43 }
  0x50   :  { %569 = vmatpush1.bf16.msra.mxu1 %v768_v43  ;;  %517 = vmatprep.subr.bf16.mxu0 %v773_v44 }
  0x51   :  { %570 = vmatprep.subr.bf16.mxu1 %v773_v44 }
  0x53   :  { %518 = vmatpush1.bf16.msra.mxu0 %v771_v45 }
  0x54   :  { %571 = vmatpush1.bf16.msra.mxu1 %v771_v45  ;;  %519 = vmatprep.subr.bf16.mxu0 %v776_v46 }
  0x55   :  { %572 = vmatprep.subr.bf16.mxu1 %v776_v46 }
  0x57   :  { %520 = vmatpush1.bf16.msra.mxu0 %v774_v47 }
  0x58   :  { %573 = vmatpush1.bf16.msra.mxu1 %v774_v47  ;;  %521 = vmatprep.subr.bf16.mxu0 %v779_v48 }
  0x59   :  { %574 = vmatprep.subr.bf16.mxu1 %v779_v48 }
  0x5b   :  { %522 = vmatpush1.bf16.msra.mxu0 %v777_v49 }
  0x5c   :  { %575 = vmatpush1.bf16.msra.mxu1 %v777_v49  ;;  %523 = vmatprep.subr.bf16.mxu0 %v782_v50 }
  0x5d   :  { %576 = vmatprep.subr.bf16.mxu1 %v782_v50 }
  0x5f   :  { %524 = vmatpush1.bf16.msra.mxu0 %v780_v51 }
  0x60   :  { %577 = vmatpush1.bf16.msra.mxu1 %v780_v51 }
  0x62   :  { %542 = vmatmul.mubr.bf16.vlgmr.msra.gmra.mxu0 %v758_v36 }
  0x63   :  { %595 = vmatmul.mubr.bf16.vlgmr.msra.gmra.mxu1 %v783_v52 }
  0xe2   :  { %v182_v53 = vpop.f32.mrf.mxu0 }
  0xe3   :  { %v311_v54 = vpop.f32.mrf.mxu1 }
  0xe4   :  { %v184_v55 = vpop.f32.mrf.mxu0  ;;  %v312_v5 = vadd.f32 %v311_v54, %v182_v53 }
  0xe5   :  { %v313_v56 = vpop.f32.mrf.mxu1 }
  0xe6   :  { %v186_v57 = vpop.f32.mrf.mxu0  ;;  %v314_v9 = vadd.f32 %v313_v56, %v184_v55 }
  0xe7   :  { %v315_v58 = vpop.f32.mrf.mxu1 }
  0xe8   :  { %v188_v59 = vpop.f32.mrf.mxu0  ;;  %v316_v15 = vadd.f32 %v315_v58, %v186_v57 }
  0xe9   :  { %v317_v60 = vpop.f32.mrf.mxu1 }
  0xea   :  { %v318_v19 = vadd.f32 %v317_v60, %v188_v59 }
 0x102   :  { %v360_v61 = vpop.f32.mrf.mxu0 }
 0x103   :  { %v403_v62 = vpop.f32.mrf.mxu1 }
 0x104   :  { %v362_v63 = vpop.f32.mrf.mxu0  ;;  %v404_v6 = vadd.f32 %v403_v62, %v360_v61 }
 0x105   :  { %v405_v0 = vpop.f32.mrf.mxu1 }
 0x106   :  { %v364_v1 = vpop.f32.mrf.mxu0  ;;  %v406_v10 = vadd.f32 %v405_v0, %v362_v63 }
 0x107   :  { %v407_v2 = vpop.f32.mrf.mxu1 }
 0x108   :  { %v366_v3 = vpop.f32.mrf.mxu0  ;;  %v408_v16 = vadd.f32 %v407_v2, %v364_v1 }
 0x109   :  { %v409_v4 = vpop.f32.mrf.mxu1 }
 0x10a   :  { %v410_v20 = vadd.f32 %v409_v4, %v366_v3 }
 0x122   :  { %v543_v7 = vpop.f32.mrf.mxu0 }
 0x123   :  { %v596_v8 = vpop.f32.mrf.mxu1  ;;  %v552_v11 = vadd.f32 %v543_v7, %v312_v5 }
 0x124   :  { %v605_v12 = vadd.f32 %v596_v8, %v404_v6  ;;  %v545_v13 = vpop.f32.mrf.mxu0 }
 0x125   :  { %v598_v14 = vpop.f32.mrf.mxu1  ;;  %v553_v17 = vadd.f32 %v545_v13, %v314_v9 }
 0x126   :  { %v606_v18 = vadd.f32 %v598_v14, %v406_v10  ;;  %v547_v21 = vpop.f32.mrf.mxu0  ;;  %v609_v23 = vmax.f32 %v552_v11, %v605_v12 }
 0x127   :  { %v600_v22 = vpop.f32.mrf.mxu1  ;;  %v554_v25 = vadd.f32 %v547_v21, %v316_v15 }
 0x128   :  { %v610_v24 = vmax.f32 %v553_v17, %v606_v18  ;;  %v607_v26 = vadd.f32 %v600_v22, %v408_v16  ;;  %v549_v27 = vpop.f32.mrf.mxu0 }
 0x129   :  { %v602_v28 = vpop.f32.mrf.mxu1  ;;  %v555_v30 = vadd.f32 %v549_v27, %v318_v19 }
 0x12a   :  { %v613_v29 = vmax.f32 %v609_v23, %v610_v24  ;;  %v608_v31 = vadd.f32 %v602_v28, %v410_v20  ;;  %v611_v33 = vmax.f32 %v554_v25, %v607_v26 }
 0x12c   :  { %v615_v32 = vmax.f32 %v613_v29, 0.0  ;;  %v612_v34 = vmax.f32 %v555_v30, %v608_v31 }
 0x12e   :  { %617 = vst [vmem:[%s1048_s5] sm:$0xff] %v615_v32  ;;  %v614_v35 = vmax.f32 %v611_v33, %v612_v34 }
 0x130   :  { %v616_v36 = vmax.f32 %v614_v35, 0.0 }
 0x132   :  { %618 = vst [vmem:[%s1048_s5 + $0x8] sm:$0xff] %v616_v36 }

</bundles_post_ra>
